<compile_context>
chip_gen: v7x
topology: tpu7x:2x2x1
jax: 0.10.0
libtpu: 0.0.40
codegen_flags: <defaults>
</compile_context>

<pallas_src>
import functools

import jax
import jax.numpy as jnp
from jax.experimental import pallas as pl
from jax.experimental.pallas import tpu as pltpu

# Sobel kernels (same as the PyTorch module) -- used by the pure-JAX reference.
_KX = ((-1.0, -2.0, -1.0),
       ( 0.0,  0.0,  0.0),
       ( 1.0,  2.0,  1.0))
_KY = ((-1.0,  0.0,  1.0),
       (-2.0,  0.0,  2.0),
       (-1.0,  0.0,  1.0))

_PREC = jax.lax.Precision.HIGHEST  # faithful f32 semantics, independent of ambient default


def _pick_view_batch(v, h, w, itemsize, cap=16, budget=6 << 20):
    """Largest divisor of v (<= cap) whose per-step working set fits `budget`."""
    fixed = 4 * (2 * h * h + 2 * w * w) + 3 * 4 * h * w + (64 << 10)
    per_view = h * w * (4 * itemsize + 12)   # 2x double-buffered inputs + d + hz (f32)
    best = 1
    for vb in range(1, min(v, cap) + 1):
        if v % vb == 0 and fixed + vb * per_view <= budget:
            best = vb
    return best


def _edge_loss_kernel(pred_ref, targ_ref, out_ref, *, vb, h, w):
    # pred_ref / targ_ref: (vb, h, w) channel-0 tiles of vb consecutive views.
    # out_ref: (1, 1) f32 SMEM partial sum for this grid step.
    f32 = jnp.float32

    # ---- 1-D Sobel band operators, generated in-register (zero padding=1 is
    #      implicit: out-of-range taps have no matrix entry).
    ri = jax.lax.broadcasted_iota(jnp.int32, (h, h), 0)
    ci = jax.lax.broadcasted_iota(jnp.int32, (h, h), 1)
    dv = ci - ri
    # (d1 @ x)[i] = x[i+1] - x[i-1]        (vertical [-1, 0, 1])
    d1 = jnp.where(dv == 1, f32(1.0), f32(0.0)) - jnp.where(dv == -1, f32(1.0), f32(0.0))
    # (s1 @ x)[i] = x[i-1] + 2 x[i] + x[i+1]  (vertical [1, 2, 1])
    s1 = jnp.where(dv == 0, f32(2.0), f32(0.0)) + jnp.where(jnp.abs(dv) == 1, f32(1.0), f32(0.0))

    # Fused horizontal operator B = hstack([smooth, diff]) of shape (w, 2w):
    #   (x @ B)[:, :w]  = x[:, j-1] + 2 x[:, j] + x[:, j+1]
    #   (x @ B)[:, w:]  = x[:, j+1] - x[:, j-1]
    ra = jax.lax.broadcasted_iota(jnp.int32, (w, 2 * w), 0)
    cb = jax.lax.broadcasted_iota(jnp.int32, (w, 2 * w), 1)
    is_smooth = cb < w
    dh = ra - jnp.where(is_smooth, cb, cb - w)
    sm = jnp.where(dh == 0, f32(2.0), f32(0.0)) + jnp.where(jnp.abs(dh) == 1, f32(1.0), f32(0.0))
    df = jnp.where(dh == 1, f32(1.0), f32(0.0)) - jnp.where(dh == -1, f32(1.0), f32(0.0))
    b_mat = jnp.where(is_smooth, sm, df)

    # ---- Sobel of the difference (linearity); upcast in-kernel (bf16-friendly).
    d = (pred_ref[...].astype(f32) - targ_ref[...].astype(f32)).reshape(vb * h, w)

    # ---- Horizontal pass: one fused matmul on the MXU.
    hz = jnp.dot(d, b_mat, precision=_PREC, preferred_element_type=f32)

    # ---- Vertical pass per view (static unroll); accumulate squared-edge
    #      partials immediately to keep live intermediates low.
    partial = f32(0.0)
    for vi in range(vb):
        hv = hz[vi * h:(vi + 1) * h, :]
        gx = jnp.dot(d1, hv[:, :w], precision=_PREC, preferred_element_type=f32)
        partial = partial + jnp.sum(gx * gx)
        gy = jnp.dot(s1, hv[:, w:], precision=_PREC, preferred_element_type=f32)
        partial = partial + jnp.sum(gy * gy)

    out_ref[0, 0] = partial


def edge_loss(pred, target):
    """pred, target: [V, C, H, W] (NCHW). Returns scalar loss (float32)."""
    V, _C, H, W = pred.shape
    n = V * H * W
    itemsize = int(jnp.dtype(pred.dtype).itemsize)

    vb = _pick_view_batch(V, H, W, itemsize)
    num_steps = V // vb
    kernel = functools.partial(_edge_loss_kernel, vb=vb, h=H, w=W)

    partials = pl.pallas_call(
        kernel,
        out_shape=jax.ShapeDtypeStruct((num_steps, 1), jnp.float32),
        grid=(num_steps,),
        in_specs=[
            # channel-0 (vb, H, W) slab of vb consecutive views, straight from NCHW HBM
            pl.BlockSpec((vb, None, H, W), lambda s: (s, 0, 0, 0)),
            pl.BlockSpec((vb, None, H, W), lambda s: (s, 0, 0, 0)),
        ],
        out_specs=pl.BlockSpec((1, 1), lambda s: (s, 0),
                               memory_space=pltpu.MemorySpace.SMEM),
        compiler_params=pltpu.CompilerParams(
            dimension_semantics=("parallel",),          # independent steps -> megacore-friendly
            vmem_limit_bytes=32 * 1024 * 1024),
        cost_estimate=pl.CostEstimate(
            flops=4 * V * H * W * (H + W) + 8 * V * H * W,
            transcendentals=0,
            bytes_accessed=2 * V * H * W * itemsize + 4 * num_steps),
    )(pred, target)

    return jnp.sum(partials) * (0.5 / n)


# ----------------------------------------------------------------------------
# Pure-JAX reference (direct 3x3 tap formulation, matching the PyTorch module)
# ----------------------------------------------------------------------------
def _edge_loss_ref(pred, target):
    p0 = pred[:, 0, :, :].astype(jnp.float32)
    t0 = target[:, 0, :, :].astype(jnp.float32)
    V, H, W = p0.shape
    pp = jnp.pad(p0, ((0, 0), (1, 1), (1, 1)))
    tp = jnp.pad(t0, ((0, 0), (1, 1), (1, 1)))
    pe_x = te_x = pe_y = te_y = jnp.zeros((V, H, W), jnp.float32)
    for dy in range(3):
        for dx in range(3):
            wx, wy = _KX[dy][dx], _KY[dy][dx]
            p = pp[:, dy:dy + H, dx:dx + W]
            t = tp[:, dy:dy + H, dx:dx + W]
            pe_x = pe_x + wx * p
            te_x = te_x + wx * t
            pe_y = pe_y + wy * p
            te_y = te_y + wy * t
    return (jnp.mean((pe_x - te_x) ** 2) + jnp.mean((pe_y - te_y) ** 2)) / 2.0


if __name__ == "__main__":
    key = jax.random.PRNGKey(0)
    k1, k2 = jax.random.split(key)
    V, C, H, W = 2, 4, 16, 16
    pred = jax.random.normal(k1, (V, C, H, W), dtype=jnp.float32)
    target = jax.random.normal(k2, (V, C, H, W), dtype=jnp.float32)

    loss = jax.block_until_ready(edge_loss(pred, target))
    ref = jax.block_until_ready(_edge_loss_ref(pred, target))

    assert jnp.allclose(loss, ref, rtol=1e-5, atol=1e-6), (loss, ref)
    print("KERNEL_OK")
</pallas_src>

<mosaic_0001>
module attributes {stable_mosaic.version = 11 : i64} {
  func.func @_edge_loss_kernel(%arg0: i32, %arg1: memref<2x1x16x16xf32, #tpu.memory_space<vmem>>, %arg2: memref<2x1x16x16xf32, #tpu.memory_space<vmem>>, %arg3: memref<1x1xf32, #tpu.memory_space<smem>>) attributes {dimension_semantics = [#tpu.dimension_semantics<parallel>], iteration_bounds = array<i64: 1>, scalar_prefetch = 0 : i64, scratch_operands = 0 : i64, tpu.core_type = #tpu.core_type<tc>, window_params = [{transform_indices = @transform_0, window_bounds = array<i64: 2, 1, 16, 16>}, {transform_indices = @transform_1, window_bounds = array<i64: 2, 1, 16, 16>}, {transform_indices = @transform_2, window_bounds = array<i64: 1, 1>}]} {
    %0 = tpu.iota {dimensions = array<i32: 0>} : vector<16x16xi32>
    %1 = tpu.iota {dimensions = array<i32: 1>} : vector<16x16xi32>
    %2 = arith.subi %1, %0 : vector<16x16xi32>
    %c1_i32 = arith.constant 1 : i32
    %3 = vector.broadcast %c1_i32 : i32 to vector<16x16xi32>
    %4 = arith.cmpi eq, %2, %3 : vector<16x16xi32>
    %cst = arith.constant 1.000000e+00 : f32
    %cst_0 = arith.constant 0.000000e+00 : f32
    %5 = vector.broadcast %cst : f32 to vector<16x16xf32>
    %6 = vector.broadcast %cst_0 : f32 to vector<16x16xf32>
    %7 = arith.select %4, %5, %6 : vector<16x16xi1>, vector<16x16xf32>
    %c-1_i32 = arith.constant -1 : i32
    %8 = vector.broadcast %c-1_i32 : i32 to vector<16x16xi32>
    %9 = arith.cmpi eq, %2, %8 : vector<16x16xi32>
    %cst_1 = arith.constant 1.000000e+00 : f32
    %cst_2 = arith.constant 0.000000e+00 : f32
    %10 = vector.broadcast %cst_1 : f32 to vector<16x16xf32>
    %11 = vector.broadcast %cst_2 : f32 to vector<16x16xf32>
    %12 = arith.select %9, %10, %11 : vector<16x16xi1>, vector<16x16xf32>
    %13 = arith.subf %7, %12 : vector<16x16xf32>
    %c0_i32 = arith.constant 0 : i32
    %14 = vector.broadcast %c0_i32 : i32 to vector<16x16xi32>
    %15 = arith.cmpi eq, %2, %14 : vector<16x16xi32>
    %cst_3 = arith.constant 2.000000e+00 : f32
    %cst_4 = arith.constant 0.000000e+00 : f32
    %16 = vector.broadcast %cst_3 : f32 to vector<16x16xf32>
    %17 = vector.broadcast %cst_4 : f32 to vector<16x16xf32>
    %18 = arith.select %15, %16, %17 : vector<16x16xi1>, vector<16x16xf32>
    %19 = math.absi %2 : vector<16x16xi32>
    %c1_i32_5 = arith.constant 1 : i32
    %20 = vector.broadcast %c1_i32_5 : i32 to vector<16x16xi32>
    %21 = arith.cmpi eq, %19, %20 : vector<16x16xi32>
    %cst_6 = arith.constant 1.000000e+00 : f32
    %cst_7 = arith.constant 0.000000e+00 : f32
    %22 = vector.broadcast %cst_6 : f32 to vector<16x16xf32>
    %23 = vector.broadcast %cst_7 : f32 to vector<16x16xf32>
    %24 = arith.select %21, %22, %23 : vector<16x16xi1>, vector<16x16xf32>
    %25 = arith.addf %18, %24 : vector<16x16xf32>
    %26 = tpu.iota {dimensions = array<i32: 0>} : vector<16x32xi32>
    %27 = tpu.iota {dimensions = array<i32: 1>} : vector<16x32xi32>
    %c16_i32 = arith.constant 16 : i32
    %28 = vector.broadcast %c16_i32 : i32 to vector<16x32xi32>
    %29 = arith.cmpi slt, %27, %28 : vector<16x32xi32>
    %c16_i32_8 = arith.constant 16 : i32
    %30 = vector.broadcast %c16_i32_8 : i32 to vector<16x32xi32>
    %31 = arith.subi %27, %30 : vector<16x32xi32>
    %32 = arith.select %29, %27, %31 : vector<16x32xi1>, vector<16x32xi32>
    %33 = arith.subi %26, %32 : vector<16x32xi32>
    %c0_i32_9 = arith.constant 0 : i32
    %34 = vector.broadcast %c0_i32_9 : i32 to vector<16x32xi32>
    %35 = arith.cmpi eq, %33, %34 : vector<16x32xi32>
    %cst_10 = arith.constant 2.000000e+00 : f32
    %cst_11 = arith.constant 0.000000e+00 : f32
    %36 = vector.broadcast %cst_10 : f32 to vector<16x32xf32>
    %37 = vector.broadcast %cst_11 : f32 to vector<16x32xf32>
    %38 = arith.select %35, %36, %37 : vector<16x32xi1>, vector<16x32xf32>
    %39 = math.absi %33 : vector<16x32xi32>
    %c1_i32_12 = arith.constant 1 : i32
    %40 = vector.broadcast %c1_i32_12 : i32 to vector<16x32xi32>
    %41 = arith.cmpi eq, %39, %40 : vector<16x32xi32>
    %cst_13 = arith.constant 1.000000e+00 : f32
    %cst_14 = arith.constant 0.000000e+00 : f32
    %42 = vector.broadcast %cst_13 : f32 to vector<16x32xf32>
    %43 = vector.broadcast %cst_14 : f32 to vector<16x32xf32>
    %44 = arith.select %41, %42, %43 : vector<16x32xi1>, vector<16x32xf32>
    %45 = arith.addf %38, %44 : vector<16x32xf32>
    %c1_i32_15 = arith.constant 1 : i32
    %46 = vector.broadcast %c1_i32_15 : i32 to vector<16x32xi32>
    %47 = arith.cmpi eq, %33, %46 : vector<16x32xi32>
    %cst_16 = arith.constant 1.000000e+00 : f32
    %cst_17 = arith.constant 0.000000e+00 : f32
    %48 = vector.broadcast %cst_16 : f32 to vector<16x32xf32>
    %49 = vector.broadcast %cst_17 : f32 to vector<16x32xf32>
    %50 = arith.select %47, %48, %49 : vector<16x32xi1>, vector<16x32xf32>
    %c-1_i32_18 = arith.constant -1 : i32
    %51 = vector.broadcast %c-1_i32_18 : i32 to vector<16x32xi32>
    %52 = arith.cmpi eq, %33, %51 : vector<16x32xi32>
    %cst_19 = arith.constant 1.000000e+00 : f32
    %cst_20 = arith.constant 0.000000e+00 : f32
    %53 = vector.broadcast %cst_19 : f32 to vector<16x32xf32>
    %54 = vector.broadcast %cst_20 : f32 to vector<16x32xf32>
    %55 = arith.select %52, %53, %54 : vector<16x32xi1>, vector<16x32xf32>
    %56 = arith.subf %50, %55 : vector<16x32xf32>
    %57 = arith.select %29, %45, %56 : vector<16x32xi1>, vector<16x32xf32>
    %c0 = arith.constant 0 : index
    %c0_21 = arith.constant 0 : index
    %c0_22 = arith.constant 0 : index
    %c0_23 = arith.constant 0 : index
    %58 = vector.load %arg1[%c0, %c0_21, %c0_22, %c0_23] : memref<2x1x16x16xf32, #tpu.memory_space<vmem>>, vector<2x1x16x16xf32>
    %59 = vector.shape_cast %58 : vector<2x1x16x16xf32> to vector<2x16x16xf32>
    %c0_24 = arith.constant 0 : index
    %c0_25 = arith.constant 0 : index
    %c0_26 = arith.constant 0 : index
    %c0_27 = arith.constant 0 : index
    %60 = vector.load %arg2[%c0_24, %c0_25, %c0_26, %c0_27] : memref<2x1x16x16xf32, #tpu.memory_space<vmem>>, vector<2x1x16x16xf32>
    %61 = vector.shape_cast %60 : vector<2x1x16x16xf32> to vector<2x16x16xf32>
    %62 = arith.subf %59, %61 : vector<2x16x16xf32>
    %63 = vector.shape_cast %62 : vector<2x16x16xf32> to vector<32x16xf32>
    %cst_28 = arith.constant dense<0.000000e+00> : vector<32x32xf32>
    %64 = tpu.matmul %63, %57, %cst_28 {dimension_numbers = #tpu.dot_dimension_numbers<[1], [0], [0], [1], [0, 0, 1, 1], [], []>, precision = #tpu.contract_precision<fp32>} : vector<32x16xf32>, vector<16x32xf32>, vector<32x32xf32> -> vector<32x32xf32>
    %65 = vector.extract_strided_slice %64 {offsets = [0, 0], sizes = [16, 32], strides = [1, 1]} : vector<32x32xf32> to vector<16x32xf32>
    %66 = vector.extract_strided_slice %65 {offsets = [0, 0], sizes = [16, 16], strides = [1, 1]} : vector<16x32xf32> to vector<16x16xf32>
    %cst_29 = arith.constant dense<0.000000e+00> : vector<16x16xf32>
    %67 = tpu.matmul %13, %66, %cst_29 {dimension_numbers = #tpu.dot_dimension_numbers<[1], [0], [0], [1], [0, 0, 1, 1], [], []>, precision = #tpu.contract_precision<fp32>} : vector<16x16xf32>, vector<16x16xf32>, vector<16x16xf32> -> vector<16x16xf32>
    %68 = arith.mulf %67, %67 : vector<16x16xf32>
    %69 = vector.shape_cast %68 : vector<16x16xf32> to vector<1x16x16xf32>
    %cst_30 = arith.constant dense<0.000000e+00> : vector<1xf32>
    %70 = vector.multi_reduction <add>, %69, %cst_30 [1, 2] : vector<1x16x16xf32> to vector<1xf32>
    %71 = vector.shape_cast %70 : vector<1xf32> to vector<1x1x1xf32>
    %72 = vector.extract %71[0, 0, 0] : f32 from vector<1x1x1xf32>
    %cst_31 = arith.constant 0.000000e+00 : f32
    %73 = arith.addf %cst_31, %72 : f32
    %74 = vector.extract_strided_slice %65 {offsets = [0, 16], sizes = [16, 16], strides = [1, 1]} : vector<16x32xf32> to vector<16x16xf32>
    %cst_32 = arith.constant dense<0.000000e+00> : vector<16x16xf32>
    %75 = tpu.matmul %25, %74, %cst_32 {dimension_numbers = #tpu.dot_dimension_numbers<[1], [0], [0], [1], [0, 0, 1, 1], [], []>, precision = #tpu.contract_precision<fp32>} : vector<16x16xf32>, vector<16x16xf32>, vector<16x16xf32> -> vector<16x16xf32>
    %76 = arith.mulf %75, %75 : vector<16x16xf32>
    %77 = vector.shape_cast %76 : vector<16x16xf32> to vector<1x16x16xf32>
    %cst_33 = arith.constant dense<0.000000e+00> : vector<1xf32>
    %78 = vector.multi_reduction <add>, %77, %cst_33 [1, 2] : vector<1x16x16xf32> to vector<1xf32>
    %79 = vector.shape_cast %78 : vector<1xf32> to vector<1x1x1xf32>
    %80 = vector.extract %79[0, 0, 0] : f32 from vector<1x1x1xf32>
    %81 = arith.addf %73, %80 : f32
    %82 = vector.extract_strided_slice %64 {offsets = [16, 0], sizes = [16, 32], strides = [1, 1]} : vector<32x32xf32> to vector<16x32xf32>
    %83 = vector.extract_strided_slice %82 {offsets = [0, 0], sizes = [16, 16], strides = [1, 1]} : vector<16x32xf32> to vector<16x16xf32>
    %cst_34 = arith.constant dense<0.000000e+00> : vector<16x16xf32>
    %84 = tpu.matmul %13, %83, %cst_34 {dimension_numbers = #tpu.dot_dimension_numbers<[1], [0], [0], [1], [0, 0, 1, 1], [], []>, precision = #tpu.contract_precision<fp32>} : vector<16x16xf32>, vector<16x16xf32>, vector<16x16xf32> -> vector<16x16xf32>
    %85 = arith.mulf %84, %84 : vector<16x16xf32>
    %86 = vector.shape_cast %85 : vector<16x16xf32> to vector<1x16x16xf32>
    %cst_35 = arith.constant dense<0.000000e+00> : vector<1xf32>
    %87 = vector.multi_reduction <add>, %86, %cst_35 [1, 2] : vector<1x16x16xf32> to vector<1xf32>
    %88 = vector.shape_cast %87 : vector<1xf32> to vector<1x1x1xf32>
    %89 = vector.extract %88[0, 0, 0] : f32 from vector<1x1x1xf32>
    %90 = arith.addf %81, %89 : f32
    %91 = vector.extract_strided_slice %82 {offsets = [0, 16], sizes = [16, 16], strides = [1, 1]} : vector<16x32xf32> to vector<16x16xf32>
    %cst_36 = arith.constant dense<0.000000e+00> : vector<16x16xf32>
    %92 = tpu.matmul %25, %91, %cst_36 {dimension_numbers = #tpu.dot_dimension_numbers<[1], [0], [0], [1], [0, 0, 1, 1], [], []>, precision = #tpu.contract_precision<fp32>} : vector<16x16xf32>, vector<16x16xf32>, vector<16x16xf32> -> vector<16x16xf32>
    %93 = arith.mulf %92, %92 : vector<16x16xf32>
    %94 = vector.shape_cast %93 : vector<16x16xf32> to vector<1x16x16xf32>
    %cst_37 = arith.constant dense<0.000000e+00> : vector<1xf32>
    %95 = vector.multi_reduction <add>, %94, %cst_37 [1, 2] : vector<1x16x16xf32> to vector<1xf32>
    %96 = vector.shape_cast %95 : vector<1xf32> to vector<1x1x1xf32>
    %97 = vector.extract %96[0, 0, 0] : f32 from vector<1x1x1xf32>
    %98 = arith.addf %90, %97 : f32
    %c0_38 = arith.constant 0 : index
    %c0_39 = arith.constant 0 : index
    %99 = memref.load %arg3[%c0_38, %c0_39] : memref<1x1xf32, #tpu.memory_space<smem>>
    memref.store %98, %arg3[%c0_38, %c0_39] : memref<1x1xf32, #tpu.memory_space<smem>>
    return
  }
  func.func @transform_0(%arg0: i32) -> (i32, i32, i32, i32) {
    %c0_i32 = arith.constant 0 : i32
    %c0_i32_0 = arith.constant 0 : i32
    %c0_i32_1 = arith.constant 0 : i32
    %c0_i32_2 = arith.constant 0 : i32
    return %arg0, %c0_i32, %c0_i32_0, %c0_i32_1 : i32, i32, i32, i32
  }
  func.func @transform_1(%arg0: i32) -> (i32, i32, i32, i32) {
    %c0_i32 = arith.constant 0 : i32
    %c0_i32_0 = arith.constant 0 : i32
    %c0_i32_1 = arith.constant 0 : i32
    %c0_i32_2 = arith.constant 0 : i32
    return %arg0, %c0_i32, %c0_i32_0, %c0_i32_1 : i32, i32, i32, i32
  }
  func.func @transform_2(%arg0: i32) -> (i32, i32) {
    %c0_i32 = arith.constant 0 : i32
    %c0_i32_0 = arith.constant 0 : i32
    return %arg0, %c0_i32 : i32, i32
  }
}

</mosaic_0001>

<bundles_post_ra>
// kernel: tpu_custom_call.1
= control target key start
LH: loop header
LB: loop body
LE: loop exit
PB: predicated region body
PF: predicated region fallthrough
CT: control target
= control target key end

     0   :  { %7 = vsyncpa [#allocation3], 0  ;;  %s3710_s0 = inlined_call_operand.hbm [shape: f32[2,4,16,16], index: 0, kind: input, shape index: {}]   ;;  %s3711_s1 = inlined_call_operand.hbm [shape: f32[2,4,16,16], index: 1, kind: input, shape index: {}]   ;;  %s3712_s2 = inlined_call_operand.hbm [shape: f32[1,1], index: 2, kind: output, shape index: {}]  }
   0x1   :  { %8 = vsyncpa [#allocation6], 0 }
   0x2   :  { %9 = vsyncpa [#allocation4], 0 }
   0x3   :  { %s19_s9 = sld [smem:[#allocation0]]   ;;  %s3474_s10 = smov [#allocation2]  }
   0x4   :  { %s27_s11 = sshll.u32 %s3474_s10, 4  ;;  %s3475_s12 = smov 1024   ;;  %s28_s11 = int_to_ptr.vmem [resolvable:$true] %s27_s11 }
   0x5   :  { %34 = sst [smem:[#allocation9]] %s3475_s12  ;;  %s3476_s13 = smov 256  }
   0x6   :  { %36 = sst [smem:[#allocation9 + $0x1]] %s3476_s13  ;;  %s3477_s14 = smov 2  }
   0x7   :  { %38 = sst [smem:[#allocation9 + $0x2]] %s3477_s14  ;;  %s3478_s16 = smov 128  }
   0x8   :  { %40 = sst [smem:[#allocation9 + $0x3]] %s3478_s16  ;;  %s3479_s18 = smov 8  }
   0x9   :  { %s2882_s15 = sshll.u32 %s19_s9, 26  ;;  %42 = sst [smem:[#allocation9 + $0x4]] %s3478_s16 }
   0xa   :  { %s2883_s17 = sadd.s32 134217728, %s2882_s15  ;;  %44 = sst [smem:[#allocation9 + $0x5]] %s3479_s18 }
   0xb   :  { %s3480_s19 = smov [#allocation3]   ;;  %s3481_s20 = smov [#allocation8]  }
   0xc   :  { %46 = dma.general %s3710_s0, 512, %s28_s11, %s3480_s19, %s3481_s20, [#allocation9], %s2883_s17, 0  }
   0xd   :  { %s56_s23 = sld [smem:[#allocation0]]   ;;  %s3482_s24 = smov [#allocation5]  }
   0xe   :  { %s64_s25 = sshll.u32 %s3482_s24, 4  ;;  %s3483_s26 = smov 1024   ;;  %s65_s25 = int_to_ptr.vmem [resolvable:$true] %s64_s25 }
   0xf   :  { %71 = sst [smem:[#allocation11]] %s3483_s26  ;;  %s3484_s27 = smov 256  }
  0x10   :  { %73 = sst [smem:[#allocation11 + $0x1]] %s3484_s27  ;;  %s3485_s28 = smov 2  }
  0x11   :  { %75 = sst [smem:[#allocation11 + $0x2]] %s3485_s28  ;;  %s3486_s30 = smov 128  }
  0x12   :  { %77 = sst [smem:[#allocation11 + $0x3]] %s3486_s30  ;;  %s3487_s4 = smov 8  }
  0x13   :  { %s2884_s29 = sshll.u32 %s56_s23, 26  ;;  %79 = sst [smem:[#allocation11 + $0x4]] %s3486_s30 }
  0x14   :  { %s2885_s3 = sadd.s32 134217728, %s2884_s29  ;;  %81 = sst [smem:[#allocation11 + $0x5]] %s3487_s4 }
  0x15   :  { %s3488_s5 = smov [#allocation6]   ;;  %s3489_s6 = smov [#allocation10]  }
  0x16   :  { %83 = dma.general %s3711_s1, 512, %s65_s25, %s3488_s5, %s3489_s6, [#allocation11], %s2885_s3, 0  }
  0x17   :  { %3468 = dma.done.wait [#allocation3], 512  }
  0x18   :  { %3469 = vsyncadd [#allocation3], 4294966784 }
  0x19   :  { %3470 = dma.done.wait [#allocation6], 512  }
  0x1a   :  { %3471 = vsyncadd [#allocation6], 4294966784  ;;  %v90_v0 = vlaneseq  ;;  %v156_v8 = vld [vmem:[#allocation2] sm:$0xff]  ;;  %vm168_vm1 = vcmask 130048   ;;  %v157_v13 = vld [vmem:[#allocation2 + $0x8] sm:$0xff]  ;;  %v3490_v15 = vmov 0.0  }
  0x1b   :  { %v160_v9 = vld [vmem:[#allocation5] sm:$0xff]  ;;  %v161_v14 = vld [vmem:[#allocation5 + $0x8] sm:$0xff]  ;;  %v158_v24 = vld [vmem:[#allocation2 + $0x10] sm:$0xff]  ;;  %s3491_s1 = smov 112   ;;  %s3458_s17 = scalar_lea.hbm %s3712_s2, 16 }
  0x1c   :  { %v3514_v1 = vshrl.u32 %v90_v0, 7  ;;  %v3516_v2 = vand.u32 127, %v90_v0  ;;  %v164_v10 = vsub.f32 %v156_v8, %v160_v9  ;;  %v165_v23 = vsub.f32 %v157_v13, %v161_v14  ;;  %v162_v25 = vld [vmem:[#allocation5 + $0x10] sm:$0xff]  ;;  %v159_v28 = vld [vmem:[#allocation2 + $0x18] sm:$0xff]  ;;  %p3459_p0 = scmp.ne.s32.totalorder %s3712_s2, %s3458_s17  ;;  %p3462_p1 = scmp.lt.u32.totalorder %s3458_s17, %s3712_s2 }
  0x1d   :  { %v163_v29 = vld [vmem:[#allocation5 + $0x18] sm:$0xff]  ;;  %v166_v39 = vsub.f32 %v158_v24, %v162_v25 }
  0x1e   :  { %v3519_v3 = vadd.s32 8, %v3514_v1  ;;  %vm123_vm0 = vcmp.lt.s32.totalorder %v3516_v2, 16  ;;  %v2888_v4 = vadd.s32 4294967280, %v3516_v2  ;;  %v170_v22 = vsel %vm168_vm1, %v164_v10, 0  ;;  %p3464_p2 = pnand %p3462_p1, %p3459_p0 }
  0x1f   :  { %v3537_v36 = vand.u32 4294901760, %v170_v22  ;;  %v173_v37 = vsel %vm168_vm1, %v165_v23, 0  ;;  %v167_v40 = vsub.f32 %v159_v28, %v163_v29  ;;  %v176_v47 = vsel %vm168_vm1, %v166_v39, 0 }
  0x20   :  { %v125_v5 = vsel %vm123_vm0, %v3516_v2, %v2888_v4  ;;  %v3540_v38 = vand.u32 4294901760, %v173_v37  ;;  %v268_v49 = vand.u32 4294901760, %v176_v47 }
  0x21   :  { %v126_v6 = vsub.s32 %v3514_v1, %v125_v5  ;;  %v127_v7 = vsub.s32 %v3519_v3, %v125_v5  ;;  %v249_v43 = vsub.f32 %v170_v22, %v3537_v36  ;;  %v179_v50 = vsel %vm168_vm1, %v167_v40, 0 }
  0x22   :  { %v259_v46 = vsub.f32 %v173_v37, %v3540_v38  ;;  %v278_v53 = vand.u32 4294901760, %v179_v50  ;;  %v269_v56 = vsub.f32 %v176_v47, %v268_v49 }
  0x23   :  { %vm128_vm2 = vcmp.eq.s32.totalorder %v126_v6, 0  ;;  %vm129_vm3 = vcmp.eq.s32.totalorder %v127_v7, 0  ;;  %v133_v11 = vsub.s32 0, %v126_v6  ;;  %v136_v12 = vsub.s32 0, %v127_v7 }
  0x24   :  { %v130_v16 = vsel %vm128_vm2, 2.0, %v3490_v15  ;;  %v131_v17 = vsel %vm129_vm3, 2.0, %v3490_v15  ;;  %vm144_vm4 = vcmp.eq.s32.totalorder %v126_v6, 1  ;;  %vm145_vm5 = vcmp.eq.s32.totalorder %v127_v7, 1 }
  0x25   :  { %v2889_v18 = vmin.u32 %v133_v11, %v126_v6  ;;  %v2890_v19 = vmin.u32 %v136_v12, %v127_v7  ;;  %v146_v20 = vsel %vm144_vm4, 1.0, %v3490_v15  ;;  %v147_v21 = vsel %vm145_vm5, 1.0, %v3490_v15 }
  0x26   :  { %vm148_vm6 = vcmp.eq.s32.totalorder %v126_v6, 4294967295  ;;  %vm149_vm7 = vcmp.eq.s32.totalorder %v127_v7, 4294967295  ;;  %v250_v48 = vand.u32 4294901760, %v249_v43  ;;  %v260_v52 = vand.u32 4294901760, %v259_v46 }
  0x27   :  { %vm138_vm8 = vcmp.eq.s32.totalorder %v2889_v18, 1  ;;  %vm139_vm9 = vcmp.eq.s32.totalorder %v2890_v19, 1  ;;  %v150_v26 = vsel %vm148_vm6, 1.0, %v3490_v15  ;;  %v151_v27 = vsel %vm149_vm7, 1.0, %v3490_v15 }
  0x28   :  { %v140_v30 = vsel %vm138_vm8, 1.0, %v3490_v15  ;;  %v141_v31 = vsel %vm139_vm9, 1.0, %v3490_v15  ;;  %v152_v32 = vsub.f32 %v146_v20, %v150_v26  ;;  %v153_v33 = vsub.f32 %v147_v21, %v151_v27 }
  0x29   :  { %v142_v34 = vadd.f32 %v140_v30, %v130_v16  ;;  %v143_v35 = vadd.f32 %v141_v31, %v131_v17  ;;  %v251_v55 = vsub.f32 %v249_v43, %v250_v48  ;;  %v261_v58 = vsub.f32 %v259_v46, %v260_v52 }
  0x2a   :  { %v279_v59 = vsub.f32 %v179_v50, %v278_v53  ;;  %v270_v62 = vand.u32 4294901760, %v269_v56  ;;  %v3558_v17 = vsub.s32 %v3516_v2, %v3514_v1  ;;  %v3577_v26 = vsub.s32 %v3516_v2, %v3519_v3 }
  0x2b   :  { %v154_v41 = vsel %vm123_vm0, %v142_v34, %v152_v32  ;;  %v155_v42 = vsel %vm123_vm0, %v143_v35, %v153_v33  ;;  %v252_v61 = vand.u32 4294901760, %v251_v55  ;;  %v262_v0 = vand.u32 4294901760, %v261_v58 }
  0x2c   :  { %v182_v44 = vand.u32 4294901760, %v154_v41  ;;  %v185_v45 = vand.u32 4294901760, %v155_v42  ;;  %v280_v4 = vand.u32 4294901760, %v279_v59  ;;  %v271_v6 = vsub.f32 %v269_v56, %v270_v62 }
  0x2d   :  { %3027 = vmatprep.mubr.f32.mxu0 %v252_v61  ;;  %vm97_vm10 = vcmp.eq.s32.totalorder %v3558_v17, 1  ;;  %vm101_vm11 = vcmp.eq.s32.totalorder %v3558_v17, 4294967295  ;;  %vm98_vm12 = vcmp.eq.s32.totalorder %v3577_v26, 1  ;;  %vm102_vm13 = vcmp.eq.s32.totalorder %v3577_v26, 4294967295 }
  0x2e   :  { %v3251_v51 = vpack.c.bf16 %v185_v45, %v182_v44  ;;  %v290_v54 = vsub.f32 %v154_v41, %v182_v44  ;;  %v297_v57 = vsub.f32 %v155_v42, %v185_v45  ;;  %v281_v8 = vsub.f32 %v279_v59, %v280_v4 }
  0x2f   :  { %v272_v10 = vand.u32 4294901760, %v271_v6  ;;  %v99_v18 = vsel %vm97_vm10, 1.0, %v3490_v15  ;;  %v103_v19 = vsel %vm101_vm11, 1.0, %v3490_v15  ;;  %v100_v27 = vsel %vm98_vm12, 1.0, %v3490_v15 }
  0x30   :  { %3252 = vmatprep.subr.bf16.mxu0 %v3251_v51  ;;  %v291_v60 = vand.u32 4294901760, %v290_v54  ;;  %v298_v63 = vand.u32 4294901760, %v297_v57  ;;  %v282_v12 = vand.u32 4294901760, %v281_v8  ;;  %v3259_v14 = vpack.c.bf16 %v297_v57, %v290_v54 }
  0x31   :  { %3254 = vmatpush3.bf16.msra.mxu0 %v3251_v51  ;;  %v105_v20 = vsub.f32 %v99_v18, %v103_v19  ;;  %v104_v28 = vsel %vm102_vm13, 1.0, %v3490_v15  ;;  %vm107_vm14 = vcmp.eq.s32.totalorder %v3558_v17, 0  ;;  %vm108_vm0 = vcmp.eq.s32.totalorder %v3577_v26, 0 }
  0x32   :  { %v292_v5 = vsub.f32 %v290_v54, %v291_v60  ;;  %v299_v7 = vsub.f32 %v297_v57, %v298_v63  ;;  %v3267_v16 = vpack.c.bf16 %v298_v63, %v291_v60  ;;  %v106_v29 = vsub.f32 %v100_v27, %v104_v28 }
  0x33   :  { %v770_v21 = vsel %vm168_vm1, %v105_v20, 0  ;;  %v110_v19 = vsel %vm108_vm0, 2.0, %v3490_v15 }
  0x34   :  { %3028 = vmatmul.mubr.f32.vlgmr.msra.gmra.mrb[0].mxu0 %v262_v0  ;;  %v293_v9 = vand.u32 4294901760, %v292_v5  ;;  %v300_v11 = vand.u32 4294901760, %v299_v7  ;;  %v3565_v22 = vand.u32 4294901760, %v770_v21  ;;  %v773_v30 = vsel %vm168_vm1, %v106_v29, 0 }
  0x35   :  { %3030 = vmatprep.mubr.f32.mxu0 %v272_v10  ;;  %v3584_v31 = vand.u32 4294901760, %v773_v30  ;;  %v109_v7 = vsel %vm107_vm14, 2.0, %v3490_v15 }
  0x36   :  { %v3255_v13 = vpack.c.bf16 %v300_v11, %v293_v9  ;;  %v3568_v23 = vsub.f32 %v770_v21, %v3565_v22 }
  0x37   :  { %v3587_v32 = vsub.f32 %v773_v30, %v3584_v31 }
  0x38   :  { %3031 = vmatmul.mubr.f32.gmra.mrb[2].mxu0 %v282_v12  ;;  %3256 = vmatprep.subr.bf16.mxu0 %v3255_v13  ;;  %v3571_v24 = vand.u32 4294901760, %v3568_v23 }
  0x39   :  { %3037 = vmatprep.mubr.f32.mxu0 %v3537_v36  ;;  %3258 = vmatpush3.bf16.msra.mxu0 %v3255_v13  ;;  %v3590_v33 = vand.u32 4294901760, %v3587_v32 }
  0x3a   :  { %3260 = vmatprep.subr.bf16.mxu0 %v3259_v14  ;;  %v845_v1 = vsub.f32 %v3568_v23, %v3571_v24 }
  0x3c   :  { %3038 = vmatmul.mubr.f32.vlgmr.msra.gmra.mrb[0].mxu0 %v3540_v38  ;;  %v846_v25 = vand.u32 4294901760, %v845_v1 }
  0x3d   :  { %3040 = vmatprep.mubr.f32.mxu0 %v268_v49  ;;  %3262 = vmatpush3.bf16.msra.mxu0 %v3259_v14 }
  0x3e   :  { %3264 = vmatprep.subr.bf16.mxu0 %v3251_v51  ;;  %3087 = vmatprep.mubr.f32.mxu1 %v846_v25 }
  0x40   :  { %3041 = vmatmul.mubr.f32.gmra.mrb[2].mxu0 %v278_v53 }
  0x41   :  { %3047 = vmatprep.mubr.f32.mxu0 %v249_v43 }
  0x44   :  { %3048 = vmatmul.mubr.f32.vlgmr.msra.gmra.mrb[0].mxu0 %v259_v46 }
  0x45   :  { %3050 = vmatprep.mubr.f32.mxu0 %v269_v56  ;;  %3266 = vmatpush3.bf16.msra.mxu0 %v3251_v51 }
  0x46   :  { %3268 = vmatprep.subr.bf16.mxu0 %v3267_v16 }
  0x48   :  { %3051 = vmatmul.mubr.f32.gmra.mrb[2].mxu0 %v279_v59  ;;  %v112_v59 = vsub.s32 0, %v3558_v17 }
  0x49   :  { %3057 = vmatprep.mubr.f32.mxu0 %v250_v48 }
  0x4a   :  { %v2886_v5 = vmin.u32 %v112_v59, %v3558_v17  ;;  %v115_v17 = vsub.s32 0, %v3577_v26 }
  0x4c   :  { %3058 = vmatmul.mubr.f32.vlgmr.msra.gmra.mrb[0].mxu0 %v260_v52  ;;  %vm117_vm15 = vcmp.eq.s32.totalorder %v2886_v5, 1  ;;  %v2887_v18 = vmin.u32 %v115_v17, %v3577_v26 }
  0x4d   :  { %3060 = vmatprep.mubr.f32.mxu0 %v270_v62  ;;  %3270 = vmatpush3.bf16.msra.mxu0 %v3267_v16  ;;  %v119_v8 = vsel %vm117_vm15, 1.0, %v3490_v15 }
  0x4e   :  { %3272 = vmatprep.subr.bf16.mxu0 %v3251_v51  ;;  %v121_v9 = vadd.f32 %v119_v8, %v109_v7  ;;  %vm118_vm2 = vcmp.eq.s32.totalorder %v2887_v18, 1 }
  0x4f   :  { %v120_v20 = vsel %vm118_vm2, 1.0, %v3490_v15 }
  0x50   :  { %3061 = vmatmul.mubr.f32.gmra.mrb[2].mxu0 %v280_v4  ;;  %v1301_v10 = vsel %vm168_vm1, %v121_v9, 0  ;;  %v122_v21 = vadd.f32 %v120_v20, %v110_v19 }
  0x51   :  { %3067 = vmatprep.mubr.f32.mxu0 %v3537_v36  ;;  %v3626_v11 = vand.u32 4294901760, %v1301_v10 }
  0x53   :  { %v3631_v12 = vsub.f32 %v1301_v10, %v3626_v11 }
  0x54   :  { %3068 = vmatmul.mubr.f32.vlgmr.msra.gmra.mrb[0].mxu0 %v3540_v38 }
  0x55   :  { %3070 = vmatprep.mubr.f32.mxu0 %v268_v49  ;;  %3274 = vmatpush3.bf16.msra.mxu0 %v3251_v51  ;;  %v3637_v13 = vand.u32 4294901760, %v3631_v12 }
  0x57   :  { %v1376_v14 = vsub.f32 %v3631_v12, %v3637_v13 }
  0x58   :  { %3071 = vmatmul.mubr.f32.gmra.mrb[2].mxu0 %v278_v53 }
  0x59   :  { %3077 = vmatprep.mubr.f32.mxu0 %v3537_v36  ;;  %v855_v36 = vsub.f32 %v3587_v32, %v3590_v33  ;;  %v3647_v16 = vand.u32 4294901760, %v1376_v14 }
  0x5b   :  { %v856_v46 = vand.u32 4294901760, %v855_v36 }
  0x5c   :  { %3078 = vmatmul.mubr.f32.vlgmr.msra.gmra.mrb[0].mxu0 %v3540_v38 }
  0x5d   :  { %3080 = vmatprep.mubr.f32.mxu0 %v268_v49 }
  0x60   :  { %3081 = vmatmul.mubr.f32.gmra.mrb[2].mxu0 %v278_v53 }
  0x61   :  { %3171 = vmatprep.mubr.f32.mxu0 %v846_v25 }
 0x12f   :  { %v3079_v2 = vpop.f32.mrb[0].mxu0 }
 0x130   :  { %v779_v3 = vand.u32 4294901760, %v3079_v2  ;;  %v747_v34 = vpop.f32.mrb[1].mxu0 }
 0x131   :  { %v776_v35 = vand.u32 4294901760, %v747_v34  ;;  %1294 = vrot.lane.b32.xlu0 %v747_v34, %s3491_s1 }
 0x132   :  { %v871_v37 = vsub.f32 %v3079_v2, %v779_v3 }
 0x133   :  { %v3595_v38 = vpack.c.bf16 %v779_v3, %v776_v35  ;;  %v864_v39 = vsub.f32 %v747_v34, %v776_v35  ;;  %v3082_v40 = vpop.f32.mrb[2].mxu0 }
 0x134   :  { %v872_v41 = vand.u32 4294901760, %v871_v37  ;;  %v1827_v42 = vand.u32 4294901760, %v3082_v40  ;;  %v759_v43 = vpop.f32.mrb[3].mxu0 }
 0x135   :  { %v865_v44 = vand.u32 4294901760, %v864_v39  ;;  %v1824_v45 = vand.u32 4294901760, %v759_v43  ;;  %1296 = vrot.lane.b32.xlu0 %v3079_v2, %s3491_s1  ;;  %3276 = vmatprep.subr.bf16.mxu1 %v3595_v38  ;;  %v3283_v47 = vpack.c.bf16 %v871_v37, %v864_v39 }
 0x136   :  { %v1919_v48 = vsub.f32 %v3082_v40, %v1827_v42  ;;  %2342 = vrot.lane.b32.xlu1 %v759_v43, %s3491_s1  ;;  %3278 = vmatpush3.bf16.msra.mxu1 %v3595_v38  ;;  %v873_v49 = vsub.f32 %v871_v37, %v872_v41 }
 0x137   :  { %v3601_v50 = vpack.c.bf16 %v1827_v42, %v1824_v45  ;;  %v1912_v51 = vsub.f32 %v759_v43, %v1824_v45  ;;  %v866_v52 = vsub.f32 %v864_v39, %v865_v44  ;;  %v3291_v53 = vpack.c.bf16 %v872_v41, %v865_v44 }
 0x138   :  { %v1920_v54 = vand.u32 4294901760, %v1919_v48  ;;  %v874_v55 = vand.u32 4294901760, %v873_v49 }
 0x139   :  { %v1913_v56 = vand.u32 4294901760, %v1912_v51  ;;  %3088 = vmatmul.mubr.f32.vlgmr.msra.gmra.mrb[0].mxu1 %v856_v46  ;;  %3324 = vmatprep.subr.bf16.mxu0 %v3601_v50  ;;  %v867_v57 = vand.u32 4294901760, %v866_v52  ;;  %v3331_v58 = vpack.c.bf16 %v1919_v48, %v1912_v51 }
 0x13a   :  { %2344 = vrot.lane.b32.xlu1 %v3082_v40, %s3491_s1  ;;  %3326 = vmatpush3.bf16.msra.mxu0 %v3601_v50  ;;  %v1921_v60 = vsub.f32 %v1919_v48, %v1920_v54 }
 0x13b   :  { %v3279_v61 = vpack.c.bf16 %v874_v55, %v867_v57  ;;  %3094 = vmatprep.mubr.f32.mxu1 %v3565_v22  ;;  %v1914_v62 = vsub.f32 %v1912_v51, %v1913_v56  ;;  %v3339_v63 = vpack.c.bf16 %v1920_v54, %v1913_v56 }
 0x13c   :  { %v1922_v0 = vand.u32 4294901760, %v1921_v60 }
 0x13d   :  { %3280 = vmatprep.subr.bf16.mxu1 %v3279_v61  ;;  %3172 = vmatmul.mubr.f32.vlgmr.msra.gmra.mrb[4].mxu0 %v856_v46  ;;  %v1915_v4 = vand.u32 4294901760, %v1914_v62 }
 0x13e   :  { %3282 = vmatpush3.bf16.msra.mxu1 %v3279_v61  ;;  %3178 = vmatprep.mubr.f32.mxu0 %v3565_v22 }
 0x13f   :  { %3284 = vmatprep.subr.bf16.mxu1 %v3283_v47  ;;  %v3327_v6 = vpack.c.bf16 %v1922_v0, %v1915_v4 }
 0x141   :  { %3095 = vmatmul.mubr.f32.vlgmr.msra.gmra.mrb[0].mxu1 %v3584_v31  ;;  %3328 = vmatprep.subr.bf16.mxu0 %v3327_v6 }
 0x142   :  { %3286 = vmatpush3.bf16.msra.mxu1 %v3283_v47  ;;  %3330 = vmatpush3.bf16.msra.mxu0 %v3327_v6 }
 0x143   :  { %3288 = vmatprep.subr.bf16.mxu1 %v3595_v38  ;;  %3332 = vmatprep.subr.bf16.mxu0 %v3331_v58 }
 0x144   :  { %3101 = vmatprep.mubr.f32.mxu1 %v3568_v23 }
 0x145   :  { %3179 = vmatmul.mubr.f32.vlgmr.msra.gmra.mrb[4].mxu0 %v3584_v31 }
 0x146   :  { %3334 = vmatpush3.bf16.msra.mxu0 %v3331_v58  ;;  %3185 = vmatprep.mubr.f32.mxu0 %v3568_v23 }
 0x147   :  { %3336 = vmatprep.subr.bf16.mxu0 %v3601_v50 }
 0x149   :  { %3102 = vmatmul.mubr.f32.vlgmr.msra.gmra.mrb[0].mxu1 %v3587_v32 }
 0x14a   :  { %3290 = vmatpush3.bf16.msra.mxu1 %v3595_v38  ;;  %3108 = vmatprep.mubr.f32.mxu1 %v3571_v24 }
 0x14b   :  { %3292 = vmatprep.subr.bf16.mxu1 %v3291_v53 }
 0x14d   :  { %3186 = vmatmul.mubr.f32.vlgmr.msra.gmra.mrb[4].mxu0 %v3587_v32 }
 0x14e   :  { %3338 = vmatpush3.bf16.msra.mxu0 %v3601_v50  ;;  %3192 = vmatprep.mubr.f32.mxu0 %v3571_v24 }
 0x14f   :  { %3340 = vmatprep.subr.bf16.mxu0 %v3339_v63 }
 0x151   :  { %3109 = vmatmul.mubr.f32.vlgmr.msra.gmra.mrb[0].mxu1 %v3590_v33 }
 0x152   :  { %3294 = vmatpush3.bf16.msra.mxu1 %v3291_v53  ;;  %3115 = vmatprep.mubr.f32.mxu1 %v3565_v22 }
 0x153   :  { %3296 = vmatprep.subr.bf16.mxu1 %v3595_v38 }
 0x155   :  { %3193 = vmatmul.mubr.f32.vlgmr.msra.gmra.mrb[4].mxu0 %v3590_v33 }
 0x156   :  { %3342 = vmatpush3.bf16.msra.mxu0 %v3339_v63  ;;  %3199 = vmatprep.mubr.f32.mxu0 %v3565_v22 }
 0x157   :  { %3344 = vmatprep.subr.bf16.mxu0 %v3601_v50 }
 0x159   :  { %3116 = vmatmul.mubr.f32.vlgmr.msra.gmra.mrb[0].mxu1 %v3584_v31 }
 0x15a   :  { %3298 = vmatpush3.bf16.msra.mxu1 %v3595_v38  ;;  %3122 = vmatprep.mubr.f32.mxu1 %v3565_v22 }
 0x15d   :  { %3200 = vmatmul.mubr.f32.vlgmr.msra.gmra.mrb[4].mxu0 %v3584_v31 }
 0x15e   :  { %3346 = vmatpush3.bf16.msra.mxu0 %v3601_v50  ;;  %3206 = vmatprep.mubr.f32.mxu0 %v3565_v22  ;;  %v1304_v22 = vsel %vm168_vm1, %v122_v21, 0 }
 0x15f   :  { %v3659_v23 = vand.u32 4294901760, %v1304_v22 }
 0x161   :  { %3123 = vmatmul.mubr.f32.vlgmr.msra.gmra.mrb[0].mxu1 %v3584_v31  ;;  %v3662_v24 = vsub.f32 %v1304_v22, %v3659_v23 }
 0x162   :  { %3129 = vmatprep.mubr.f32.mxu1 %v3647_v16 }
 0x163   :  { %v3665_v27 = vand.u32 4294901760, %v3662_v24 }
 0x165   :  { %3207 = vmatmul.mubr.f32.vlgmr.msra.gmra.mrb[4].mxu0 %v3584_v31  ;;  %v1386_v15 = vsub.f32 %v3662_v24, %v3665_v27 }
 0x167   :  { %v1387_v3 = vand.u32 4294901760, %v1386_v15 }
 0x1a3   :  { %v1295_v1 = vpop.permute.xlu0 %1294 }
 0x1a4   :  { %v1307_v25 = vand.u32 4294901760, %v1295_v1 }
 0x1a6   :  { %v1395_v28 = vsub.f32 %v1295_v1, %v1307_v25 }
 0x1a7   :  { %v1297_v26 = vpop.permute.xlu0 %1296 }
 0x1a8   :  { %v1396_v29 = vand.u32 4294901760, %v1395_v28  ;;  %v1310_v30 = vand.u32 4294901760, %v1297_v26  ;;  %v2343_v39 = vpop.permute.xlu1 %2342 }
 0x1a9   :  { %v2349_v43 = vand.u32 4294901760, %v2343_v39 }
 0x1aa   :  { %v3299_v31 = vpack.c.bf16 %v1310_v30, %v1307_v25  ;;  %v1402_v32 = vsub.f32 %v1297_v26, %v1310_v30  ;;  %v1397_v33 = vsub.f32 %v1395_v28, %v1396_v29 }
 0x1ab   :  { %v2437_v45 = vsub.f32 %v2343_v39, %v2349_v43 }
 0x1ac   :  { %v1403_v2 = vand.u32 4294901760, %v1402_v32  ;;  %3300 = vmatprep.subr.bf16.mxu1 %v3299_v31  ;;  %v1398_v35 = vand.u32 4294901760, %v1397_v33  ;;  %v3307_v38 = vpack.c.bf16 %v1402_v32, %v1395_v28  ;;  %v2345_v41 = vpop.permute.xlu1 %2344 }
 0x1ad   :  { %3302 = vmatpush3.bf16.msra.mxu1 %v3299_v31  ;;  %v2352_v42 = vand.u32 4294901760, %v2345_v41  ;;  %v2438_v47 = vand.u32 4294901760, %v2437_v45 }
 0x1ae   :  { %v1404_v34 = vsub.f32 %v1402_v32, %v1403_v2  ;;  %v3315_v40 = vpack.c.bf16 %v1403_v2, %v1396_v29 }
 0x1af   :  { %v2444_v44 = vsub.f32 %v2345_v41, %v2352_v42  ;;  %v3347_v48 = vpack.c.bf16 %v2352_v42, %v2349_v43  ;;  %v2439_v50 = vsub.f32 %v2437_v45, %v2438_v47 }
 0x1b0   :  { %3130 = vmatmul.mubr.f32.vlgmr.msra.gmra.mrb[2].mxu1 %v1387_v3  ;;  %v1405_v36 = vand.u32 4294901760, %v1404_v34 }
 0x1b1   :  { %3136 = vmatprep.mubr.f32.mxu1 %v3626_v11  ;;  %v2445_v46 = vand.u32 4294901760, %v2444_v44  ;;  %v2440_v52 = vand.u32 4294901760, %v2439_v50  ;;  %v3355_v54 = vpack.c.bf16 %v2444_v44, %v2437_v45 }
 0x1b2   :  { %v3303_v37 = vpack.c.bf16 %v1405_v36, %v1398_v35 }
 0x1b3   :  { %v2446_v49 = vsub.f32 %v2444_v44, %v2445_v46  ;;  %v3363_v55 = vpack.c.bf16 %v2445_v46, %v2438_v47 }
 0x1b4   :  { %3304 = vmatprep.subr.bf16.mxu1 %v3303_v37 }
 0x1b5   :  { %3306 = vmatpush3.bf16.msra.mxu1 %v3303_v37  ;;  %v2447_v51 = vand.u32 4294901760, %v2446_v49 }
 0x1b6   :  { %3308 = vmatprep.subr.bf16.mxu1 %v3307_v38 }
 0x1b7   :  { %v3351_v53 = vpack.c.bf16 %v2447_v51, %v2440_v52 }
 0x1b8   :  { %3137 = vmatmul.mubr.f32.vlgmr.msra.gmra.mrb[2].mxu1 %v3659_v23 }
 0x1b9   :  { %3310 = vmatpush3.bf16.msra.mxu1 %v3307_v38  ;;  %3143 = vmatprep.mubr.f32.mxu1 %v3631_v12 }
 0x1ba   :  { %3312 = vmatprep.subr.bf16.mxu1 %v3299_v31 }
 0x1c0   :  { %3144 = vmatmul.mubr.f32.vlgmr.msra.gmra.mrb[2].mxu1 %v3662_v24 }
 0x1c1   :  { %3314 = vmatpush3.bf16.msra.mxu1 %v3299_v31  ;;  %3150 = vmatprep.mubr.f32.mxu1 %v3637_v13 }
 0x1c2   :  { %3316 = vmatprep.subr.bf16.mxu1 %v3315_v40 }
 0x1c8   :  { %3151 = vmatmul.mubr.f32.vlgmr.msra.gmra.mrb[2].mxu1 %v3665_v27 }
 0x1c9   :  { %3318 = vmatpush3.bf16.msra.mxu1 %v3315_v40  ;;  %3157 = vmatprep.mubr.f32.mxu1 %v3626_v11 }
 0x1ca   :  { %3320 = vmatprep.subr.bf16.mxu1 %v3299_v31 }
 0x1d0   :  { %3158 = vmatmul.mubr.f32.vlgmr.msra.gmra.mrb[2].mxu1 %v3659_v23 }
 0x1d1   :  { %3322 = vmatpush3.bf16.msra.mxu1 %v3299_v31  ;;  %3164 = vmatprep.mubr.f32.mxu1 %v3626_v11 }
 0x1d2   :  { %3348 = vmatprep.subr.bf16.mxu1 %v3347_v48 }
 0x1d8   :  { %3165 = vmatmul.mubr.f32.vlgmr.msra.gmra.mrb[2].mxu1 %v3659_v23 }
 0x1d9   :  { %3350 = vmatpush3.bf16.msra.mxu1 %v3347_v48  ;;  %3213 = vmatprep.mubr.f32.mxu1 %v3647_v16 }
 0x1da   :  { %3352 = vmatprep.subr.bf16.mxu1 %v3351_v53 }
 0x1dc   :  { %3214 = vmatmul.mubr.f32.vlgmr.msra.gmra.mrb[4].mxu1 %v1387_v3 }
 0x1dd   :  { %3354 = vmatpush3.bf16.msra.mxu1 %v3351_v53  ;;  %3220 = vmatprep.mubr.f32.mxu1 %v3626_v11 }
 0x1de   :  { %3356 = vmatprep.subr.bf16.mxu1 %v3355_v54 }
 0x1e4   :  { %3221 = vmatmul.mubr.f32.vlgmr.msra.gmra.mrb[4].mxu1 %v3659_v23 }
 0x1e5   :  { %3358 = vmatpush3.bf16.msra.mxu1 %v3355_v54  ;;  %3227 = vmatprep.mubr.f32.mxu1 %v3631_v12 }
 0x1e6   :  { %3360 = vmatprep.subr.bf16.mxu1 %v3347_v48 }
 0x1ec   :  { %3228 = vmatmul.mubr.f32.vlgmr.msra.gmra.mrb[4].mxu1 %v3662_v24 }
 0x1ed   :  { %3362 = vmatpush3.bf16.msra.mxu1 %v3347_v48  ;;  %3234 = vmatprep.mubr.f32.mxu1 %v3637_v13 }
 0x1ee   :  { %3364 = vmatprep.subr.bf16.mxu1 %v3363_v55 }
 0x1f4   :  { %3235 = vmatmul.mubr.f32.vlgmr.msra.gmra.mrb[4].mxu1 %v3665_v27 }
 0x1f5   :  { %3366 = vmatpush3.bf16.msra.mxu1 %v3363_v55  ;;  %3241 = vmatprep.mubr.f32.mxu1 %v3626_v11 }
 0x1f6   :  { %3368 = vmatprep.subr.bf16.mxu1 %v3347_v48 }
 0x1fc   :  { %3242 = vmatmul.mubr.f32.vlgmr.msra.gmra.mrb[4].mxu1 %v3659_v23 }
 0x1fd   :  { %3370 = vmatpush3.bf16.msra.mxu1 %v3347_v48  ;;  %3248 = vmatprep.mubr.f32.mxu1 %v3626_v11 }
 0x204   :  { %3249 = vmatmul.mubr.f32.vlgmr.msra.gmra.mrb[4].mxu1 %v3659_v23 }
 0x234   :  { %v3124_v56 = vpop.f32.mrb[0].mxu1 }
 0x235   :  { %v1278_v57 = vmul.f32 %v3124_v56, %v3124_v56  ;;  %v1267_v58 = vpop.f32.mrb[1].mxu1 }
 0x236   :  { %v1277_v59 = vmul.f32 %v1267_v58, %v1267_v58 }
 0x237   :  { %v1280_v60 = vsel %vm168_vm1, %v1278_v57, 0.0 }
 0x238   :  { %v1279_v61 = vsel %vm168_vm1, %v1277_v59, 0.0  ;;  %v3208_v62 = vpop.f32.mrb[4].mxu0 }
 0x239   :  { %v1281_v63 = vadd.f32 %v1280_v60, %v1279_v61  ;;  %v2326_v0 = vmul.f32 %v3208_v62, %v3208_v62  ;;  %v2315_v4 = vpop.f32.mrb[5].mxu0 }
 0x23a   :  { %v2325_v5 = vmul.f32 %v2315_v4, %v2315_v4 }
 0x23b   :  { %1282 = vadd.xlane.f32.xlu0 %v1281_v63  ;;  %v2328_v6 = vsel %vm168_vm1, %v2326_v0, 0.0 }
 0x23c   :  { %v2327_v7 = vsel %vm168_vm1, %v2325_v5, 0.0 }
 0x23d   :  { %v2329_v8 = vadd.f32 %v2328_v6, %v2327_v7 }
 0x23f   :  { %2330 = vadd.xlane.f32.xlu0 %v2329_v8 }
 0x2ab   :  { %v3166_v9 = vpop.f32.mrb[2].mxu1 }
 0x2ac   :  { %v1809_v10 = vmul.f32 %v3166_v9, %v3166_v9  ;;  %v1798_v11 = vpop.f32.mrb[3].mxu1 }
 0x2ad   :  { %v1808_v12 = vmul.f32 %v1798_v11, %v1798_v11 }
 0x2ae   :  { %v1811_v13 = vsel %vm168_vm1, %v1809_v10, 0.0 }
 0x2af   :  { %v1810_v14 = vsel %vm168_vm1, %v1808_v12, 0.0 }
 0x2b0   :  { %v1812_v16 = vadd.f32 %v1811_v13, %v1810_v14 }
 0x2b2   :  { %1813 = vadd.xlane.f32.xlu1 %v1812_v16 }
 0x2c8   :  { %v1283_v17 = vpop.xlane.xlu0 %1282 }
 0x2c9   :  { %v1284_v18 = vrot.slane %v1283_v17, 4 }
 0x2cb   :  { %v1285_v19 = vadd.f32 %v1284_v18, %v1283_v17 }
 0x2cc   :  { %v2331_v30 = vpop.xlane.xlu0 %2330 }
 0x2cd   :  { %v1286_v20 = vrot.slane %v1285_v19, 2  ;;  %v2332_v15 = vrot.slane %v2331_v30, 4 }
 0x2cf   :  { %v1287_v21 = vadd.f32 %v1286_v20, %v1285_v19  ;;  %v2333_v31 = vadd.f32 %v2332_v15, %v2331_v30 }
 0x2d1   :  { %v1288_v22 = vrot.slane %v1287_v21, 1  ;;  %v2334_v32 = vrot.slane %v2333_v31, 2 }
 0x2d3   :  { %v1289_v23 = vadd.f32 %v1288_v22, %v1287_v21  ;;  %v2335_v34 = vadd.f32 %v2334_v32, %v2333_v31 }
 0x2d5   :  { %3431 = vpush %v1289_v23  ;;  %v2336_v37 = vrot.slane %v2335_v34, 1 }
 0x2d7   :  { %v3250_v24 = vpop.f32.mrb[4].mxu1  ;;  %v2337_v40 = vadd.f32 %v2336_v37, %v2335_v34 }
 0x2d8   :  { %v2851_v1 = vmul.f32 %v3250_v24, %v3250_v24  ;;  %v2840_v25 = vpop.f32.mrb[5].mxu1 }
 0x2d9   :  { %v2850_v27 = vmul.f32 %v2840_v25, %v2840_v25 }
 0x2da   :  { %v2853_v28 = vsel %vm168_vm1, %v2851_v1, 0.0 }
 0x2db   :  { %v2852_v26 = vsel %vm168_vm1, %v2850_v27, 0.0 }
 0x2dc   :  { %v2854_v29 = vadd.f32 %v2853_v28, %v2852_v26 }
 0x2de   :  { %2855 = vadd.xlane.f32.xlu0 %v2854_v29 }
 0x306   :  { %s3432_s8 = spop %3431 }
 0x33f   :  { %v1814_v33 = vpop.xlane.xlu1 %1813 }
 0x340   :  { %v1815_v2 = vrot.slane %v1814_v33, 4 }
 0x342   :  { %v1816_v3 = vadd.f32 %v1815_v2, %v1814_v33 }
 0x344   :  { %v1817_v35 = vrot.slane %v1816_v3, 2 }
 0x346   :  { %v1818_v36 = vadd.f32 %v1817_v35, %v1816_v3 }
 0x348   :  { %v1819_v38 = vrot.slane %v1818_v36, 1 }
 0x34a   :  { %v1820_v39 = vadd.f32 %v1819_v38, %v1818_v36 }
 0x34c   :  { %3433 = vpush %v1820_v39 }
 0x34d   :  { %3435 = vpush %v2337_v40 }
 0x36b   :  { %v2856_v41 = vpop.xlane.xlu0 %2855 }
 0x36c   :  { %v2857_v42 = vrot.slane %v2856_v41, 4 }
 0x36e   :  { %v2858_v43 = vadd.f32 %v2857_v42, %v2856_v41 }
 0x370   :  { %v2859_v44 = vrot.slane %v2858_v43, 2 }
 0x372   :  { %v2860_v45 = vadd.f32 %v2859_v44, %v2858_v43 }
 0x374   :  { %v2861_v46 = vrot.slane %v2860_v45, 1 }
 0x376   :  { %v2862_v47 = vadd.f32 %v2861_v46, %v2860_v45 }
 0x378   :  { %3437 = vpush %v2862_v47 }
 0x37d   :  { %s3434_s9 = spop %3433 }
 0x37e   :  { %s1822_s10 = sadd.f32 %s3434_s9, %s3432_s8  ;;  %s3436_s11 = spop %3435 }
 0x380   :  { %s2339_s12 = sadd.f32 %s3436_s11, %s1822_s10 }
 0x3a9   :  { %s3438_s13 = spop %3437 }
 0x3aa   :  { %s2864_s14 = sadd.f32 %s3438_s13, %s2339_s12 }
 0x3ac   :  { %2866 = sst [smem:[#allocation7]] %s2864_s14 }
 0x3ad   :  { %3467 = shalt.err (!%p3464_p2)
}
 0x3ae   :  { %s3492_s22 = smov [#allocation7]  }
 0x3af   :  { %2874 = dma.smem_to_hbm %s3492_s22, 16, %s3712_s2, [#allocation4]  }
 0x3b0   :  { %3472 = dma.done.wait [#allocation4], 16  }
 0x3b1   :  { %3473 = vsyncadd [#allocation4], 4294967280 }
 0x3b2   :  { %2878 = sfence }
 0x3b3   :  { %2879 = vsyncpa [#allocation3], 1 }
 0x3b4   :  { %2880 = vsyncpa [#allocation6], 1 }
 0x3b5   :  { %2881 = vsyncpa [#allocation4], 1 }

</bundles_post_ra>
